<compile_context>
chip_gen: v7x
topology: tpu7x:2x2x1
jax: 0.10.0
libtpu: 0.0.40
codegen_flags: <defaults>
</compile_context>

<pallas_src>
import math

import jax
import jax.numpy as jnp
from jax import lax
from jax.experimental import pallas as pl
from jax.experimental.pallas import tpu as pltpu


# ----------------------------------------------------------------------------
# Helpers
# ----------------------------------------------------------------------------
def _pick_tile(dim, cap, align=128):
    """Largest legal tile <= cap that divides `dim` (or the full dim)."""
    if dim <= cap:
        return dim
    t = (cap // align) * align
    while t >= align:
        if dim % t == 0:
            return t
        t -= align
    # TODO(synk): pad / mask edge blocks instead of a full-extent fallback for
    # large non-128-aligned dims (can exceed the scoped VMEM limit on v7x).
    return dim


# ----------------------------------------------------------------------------
# Tiled linear:  out = x @ w_t + b     (x: (M,K), w_t: (K,N) pre-transposed)
# ----------------------------------------------------------------------------
def linear_kernel(x_ref, w_ref, b_ref, o_ref, acc_ref):
    @pl.when(pl.program_id(2) == 0)
    def _():
        acc_ref[...] = jnp.zeros(acc_ref.shape, dtype=acc_ref.dtype)

    # Natural (M,K)x(K,N) MXU contraction: weights already in (K, N) layout,
    # so no in-kernel XLU transpose of the RHS tile.
    acc_ref[...] += jnp.dot(x_ref[...], w_ref[...],
                            preferred_element_type=jnp.float32)

    @pl.when(pl.program_id(2) == pl.num_programs(2) - 1)
    def _():
        o_ref[...] = (acc_ref[...] + b_ref[...]).astype(o_ref.dtype)


def linear(x2d, w_t, b, *, out_dtype, tm_cap=512, tn_cap=512, tk_cap=1024):
    """x2d: (M, K), w_t: (K, N), b: (N,) -> (M, N)."""
    M, K = x2d.shape
    N = w_t.shape[1]
    # TODO(synk): per-generation retune -- v5e/v6e can afford tm=512/tk=K (less
    # weight re-streaming); on v7x (64 MiB VMEM, 2 TCs) keep tiles modest and
    # verify (M/tm)*(N/tn) >= 2 so both TensorCores get work.
    tm = _pick_tile(M, tm_cap)
    tn = _pick_tile(N, tn_cap)
    tk = _pick_tile(K, tk_cap)
    grid = (M // tm, N // tn, K // tk)

    in_bytes = x2d.dtype.itemsize
    out_bytes = jnp.dtype(out_dtype).itemsize
    cost = pl.CostEstimate(
        flops=int(2 * M * N * K),
        transcendentals=0,
        bytes_accessed=int((M * K + N * K) * in_bytes + N * 4
                           + M * N * out_bytes))

    return pl.pallas_call(
        linear_kernel,
        out_shape=jax.ShapeDtypeStruct((M, N), out_dtype),
        grid_spec=pltpu.PrefetchScalarGridSpec(
            num_scalar_prefetch=0,
            grid=grid,
            in_specs=[
                pl.BlockSpec((tm, tk), lambda i, j, k: (i, k)),
                pl.BlockSpec((tk, tn), lambda i, j, k: (k, j)),
                pl.BlockSpec((1, tn), lambda i, j, k: (0, j)),
            ],
            out_specs=pl.BlockSpec((tm, tn), lambda i, j, k: (i, j)),
            scratch_shapes=[pltpu.VMEM((tm, tn), jnp.float32)],
        ),
        compiler_params=pltpu.CompilerParams(
            dimension_semantics=("parallel", "parallel", "arbitrary"),
            vmem_limit_bytes=32 * 1024 * 1024),
        cost_estimate=cost,
    )(x2d, w_t, b.reshape(1, N).astype(jnp.float32))


# ----------------------------------------------------------------------------
# Flash-style causal attention over the packed QKV tensor (B, T, 3, H, hd).
# Grid: (B, q_blocks, kv_blocks); per-head online softmax in VMEM scratch.
# Output is (B, T, C) so the final store is one lane-dense (tq, C) write.
# ----------------------------------------------------------------------------
def attn_kernel(q_ref, k_ref, v_ref, o_ref, m_ref, l_ref, acc_ref):
    _, tq, _, n_head, hd = q_ref.shape
    tk = k_ref.shape[1]
    scale = 1.0 / math.sqrt(hd)

    qi = pl.program_id(1)
    ki = pl.program_id(2)
    nk = pl.num_programs(2)

    @pl.when(ki == 0)
    def _():
        m_ref[...] = jnp.full(m_ref.shape, -jnp.inf, dtype=m_ref.dtype)
        l_ref[...] = jnp.zeros(l_ref.shape, dtype=l_ref.dtype)
        acc_ref[...] = jnp.zeros(acc_ref.shape, dtype=acc_ref.dtype)

    q_start = qi * tq
    k_start = ki * tk

    def update(apply_mask):
        if apply_mask:
            row = q_start + lax.broadcasted_iota(jnp.int32, (tq, tk), 0)
            col = k_start + lax.broadcasted_iota(jnp.int32, (tq, tk), 1)
            mask = col <= row
        # TODO(synk): for large n_head consider lax.fori_loop over heads to
        # bound vreg live ranges / code size (matters most on v7x).
        for h in range(n_head):
            q = q_ref[0, :, 0, h, :] * scale       # (tq, hd), scale folded in
            k = k_ref[0, :, 0, h, :]                # (tk, hd) bf16
            v = v_ref[0, :, 0, h, :]                # (tk, hd) bf16

            s = lax.dot_general(                    # QK^T, f32 accumulation
                q, k, dimension_numbers=(((1,), (1,)), ((), ())),
                preferred_element_type=jnp.float32)
            if apply_mask:
                s = jnp.where(mask, s, -jnp.inf)

            m_prev = m_ref[h]                                   # (tq, 1)
            m_new = jnp.maximum(m_prev, jnp.max(s, axis=-1, keepdims=True))
            alpha = jnp.exp(m_prev - m_new)
            p = jnp.exp(s - m_new)                              # (tq, tk) f32

            l_ref[h] = alpha * l_ref[h] + jnp.sum(p, axis=-1, keepdims=True)
            acc_ref[h] = alpha * acc_ref[h] + jnp.dot(
                p.astype(v.dtype), v, preferred_element_type=jnp.float32)
            m_ref[h] = m_new

    needs_mask = k_start + tk > q_start + 1   # block intersects the diagonal
    visible = k_start < q_start + tq          # block not fully in the future

    # Diagonal-intersecting blocks: masked path.
    @pl.when(jnp.logical_and(visible, needs_mask))
    def _():
        update(True)

    # Fully-visible past blocks: no mask work at all.
    @pl.when(jnp.logical_not(needs_mask))
    def _():
        update(False)

    # Fully-masked future blocks are skipped entirely (and never DMA'd thanks
    # to the clamped K/V index_map).

    # Normalize AFTER the PV matmul; single lane-dense (tq, C) store.
    @pl.when(ki == nk - 1)
    def _():
        pieces = []
        for h in range(n_head):
            inv = pl.reciprocal(l_ref[h], approx=False)   # exact; once/q-block
            pieces.append(acc_ref[h] * inv)               # (tq, hd) f32
        o_ref[0] = jnp.concatenate(pieces, axis=-1).astype(o_ref.dtype)


def flash_attention(qkv5, *, tq_cap=256, tk_cap=128):
    """qkv5: (B, T, 3, H, hd) packed QKV -> (B, T, H*hd) == (B, T, C)."""
    B, T, _, H, hd = qkv5.shape
    C = H * hd
    # TODO(synk): per-generation retune -- v5e benefits from tq up to 512
    # (halves K/V re-streaming); on v7x keep tq/tk modest (64 MiB VMEM).
    tq = _pick_tile(T, tq_cap)
    tk = _pick_tile(T, tk_cap)
    grid = (B, T // tq, T // tk)

    def q_map(b, qi, ki):
        return (b, qi, 0, 0, 0)

    def kv_map(comp):
        def im(b, qi, ki):
            # Clamp: never fetch a KV block lying entirely in the causal
            # future of this q block (repeated block index -> no DMA).
            last = (qi * tq + tq - 1) // tk
            return (b, jnp.minimum(ki, last), comp, 0, 0)
        return im

    itm = qkv5.dtype.itemsize
    cost = pl.CostEstimate(
        flops=int(4 * B * H * T * T * hd) // 2,
        transcendentals=int(B * H * T * T) // 2,
        # q read once, o written once, k/v re-read ~T/(2*tq) times (causal).
        bytes_accessed=int(B * T * C * itm * (2 + max(1, T // tq))))

    return pl.pallas_call(
        attn_kernel,
        out_shape=jax.ShapeDtypeStruct((B, T, C), qkv5.dtype),
        grid_spec=pltpu.PrefetchScalarGridSpec(
            num_scalar_prefetch=0,
            grid=grid,
            # Same packed array passed three times; index_map picks the
            # q / k / v component (axis 2) and the row block — no transposes.
            in_specs=[
                pl.BlockSpec((1, tq, 1, H, hd), q_map),
                pl.BlockSpec((1, tk, 1, H, hd), kv_map(1)),
                pl.BlockSpec((1, tk, 1, H, hd), kv_map(2)),
            ],
            out_specs=pl.BlockSpec((1, tq, C), lambda b, qi, ki: (b, qi, 0)),
            scratch_shapes=[
                pltpu.VMEM((H, tq, 1), jnp.float32),    # running max
                pltpu.VMEM((H, tq, 1), jnp.float32),    # running sum
                pltpu.VMEM((H, tq, hd), jnp.float32),   # output accumulator
            ],
        ),
        compiler_params=pltpu.CompilerParams(
            dimension_semantics=("parallel", "parallel", "arbitrary")),
        cost_estimate=cost,
    )(qkv5, qkv5, qkv5)


# ----------------------------------------------------------------------------
# Wrapper reproducing CasualSelfAttention.forward
# ----------------------------------------------------------------------------
def prepare_params(w_attn, b_attn, w_proj, b_proj, compute_dtype=jnp.bfloat16):
    """One-time weight prep: transpose torch (N,K) weights to (K,N) and cast
    to the MXU input dtype. In a real model these persist across calls, so the
    transpose/cast HBM traffic is paid once, not per forward."""
    return {
        "w_attn_t": jnp.asarray(w_attn.T, dtype=compute_dtype),   # (C, 3C)
        "b_attn": jnp.asarray(b_attn, dtype=jnp.float32),
        "w_proj_t": jnp.asarray(w_proj.T, dtype=compute_dtype),   # (C, C)
        "b_proj": jnp.asarray(b_proj, dtype=jnp.float32),
    }


def causal_self_attention(x, params, n_head):
    B, T, C = x.shape
    hd = C // n_head
    cdt = params["w_attn_t"].dtype

    xb = x.astype(cdt).reshape(B * T, C)

    # qkv = self.c_attn(x)  -> (B*T, 3C) bf16
    qkv = linear(xb, params["w_attn_t"], params["b_attn"], out_dtype=cdt)

    # Free reshape: (B, T, 3, H, hd); head/component selection happens inside
    # the attention BlockSpec index_maps (no split / transpose HBM passes).
    qkv5 = qkv.reshape(B, T, 3, n_head, hd)

    # y = F.scaled_dot_product_attention(q, k, v, is_causal=True)
    y = flash_attention(qkv5)                   # (B, T, C) bf16, lane-dense

    # y = self.c_proj(y)
    out = linear(y.reshape(B * T, C), params["w_proj_t"], params["b_proj"],
                 out_dtype=jnp.float32)
    return out.reshape(B, T, C)


# ----------------------------------------------------------------------------
# Pure-JAX f32 reference for correctness check
# ----------------------------------------------------------------------------
def reference(x, w_attn, b_attn, w_proj, b_proj, n_head):
    B, T, C = x.shape
    hd = C // n_head
    qkv = x @ w_attn.T + b_attn
    q, k, v = jnp.split(qkv, 3, axis=2)
    q = q.reshape(B, T, n_head, hd).transpose(0, 2, 1, 3)
    k = k.reshape(B, T, n_head, hd).transpose(0, 2, 1, 3)
    v = v.reshape(B, T, n_head, hd).transpose(0, 2, 1, 3)
    s = jnp.einsum("bhqd,bhkd->bhqk", q, k) / math.sqrt(hd)
    mask = jnp.tril(jnp.ones((T, T), dtype=bool))
    s = jnp.where(mask[None, None], s, -jnp.inf)
    p = jax.nn.softmax(s, axis=-1)
    y = jnp.einsum("bhqk,bhkd->bhqd", p, v)
    y = y.transpose(0, 2, 1, 3).reshape(B, T, C)
    return y @ w_proj.T + b_proj


if __name__ == "__main__":
    # Small config: B=2, T(block_size)=8, n_embd=32, n_head=4 (head_dim=8)
    B, T, C, n_head = 2, 8, 32, 4

    key = jax.random.PRNGKey(0)
    kx, k1, k2, k3, k4 = jax.random.split(key, 5)

    x = jax.random.normal(kx, (B, T, C), dtype=jnp.float32)

    # nn.Linear(n_embd, 3*n_embd): weight (3C, C), bias (3C,)
    w_attn = jax.random.normal(k1, (3 * C, C), dtype=jnp.float32) * 0.02
    b_attn = jax.random.normal(k2, (3 * C,), dtype=jnp.float32) * 0.02
    # nn.Linear(n_embd, n_embd): weight (C, C), bias (C,)
    w_proj = jax.random.normal(k3, (C, C), dtype=jnp.float32) * 0.02
    b_proj = jax.random.normal(k4, (C,), dtype=jnp.float32) * 0.02

    params = prepare_params(w_attn, b_attn, w_proj, b_proj)

    out = causal_self_attention(x, params, n_head)
    out = jax.block_until_ready(out)

    ref = reference(x, w_attn, b_attn, w_proj, b_proj, n_head)
    assert out.shape == (B, T, C)
    # bf16 MXU inputs -> relaxed tolerance vs f32 reference.
    assert jnp.allclose(out, ref, atol=1e-2, rtol=1e-2), "mismatch vs reference"

    print("KERNEL_OK")
</pallas_src>

<mosaic_0001>
module attributes {stable_mosaic.version = 11 : i64} {
  func.func @linear_kernel(%arg0: i32, %arg1: i32, %arg2: i32, %arg3: memref<16x32xbf16, #tpu.memory_space<vmem>>, %arg4: memref<32x96xbf16, #tpu.memory_space<vmem>>, %arg5: memref<1x96xf32, #tpu.memory_space<vmem>>, %arg6: memref<16x96xbf16, #tpu.memory_space<vmem>>, %arg7: memref<16x96xf32, #tpu.memory_space<vmem>>) attributes {dimension_semantics = [#tpu.dimension_semantics<parallel>, #tpu.dimension_semantics<parallel>, #tpu.dimension_semantics<arbitrary>], iteration_bounds = array<i64: 1, 1, 1>, scalar_prefetch = 0 : i64, scratch_operands = 1 : i64, tpu.core_type = #tpu.core_type<tc>, window_params = [{transform_indices = @transform_0, window_bounds = array<i64: 16, 32>}, {transform_indices = @transform_1, window_bounds = array<i64: 32, 96>}, {transform_indices = @transform_2, window_bounds = array<i64: 1, 96>}, {transform_indices = @transform_3, window_bounds = array<i64: 16, 96>}]} {
    %c0_i32 = arith.constant 0 : i32
    %0 = arith.cmpi eq, %arg2, %c0_i32 : i32
    %1 = arith.extui %0 : i1 to i32
    %c0_i32_0 = arith.constant 0 : i32
    %2 = arith.cmpi ne, %1, %c0_i32_0 : i32
    scf.if %2 {
      %cst_10 = arith.constant 0.000000e+00 : f32
      %12 = vector.broadcast %cst_10 : f32 to vector<16x96xf32>
      %c0_11 = arith.constant 0 : index
      %c0_12 = arith.constant 0 : index
      %13 = vector.load %arg7[%c0_11, %c0_12] : memref<16x96xf32, #tpu.memory_space<vmem>>, vector<16x96xf32>
      tpu.vector_store %arg7[%c0_11, %c0_12], %12 {strides = array<i32>} : memref<16x96xf32, #tpu.memory_space<vmem>>, vector<16x96xf32>,
    } else {
    }
    %c0 = arith.constant 0 : index
    %c0_1 = arith.constant 0 : index
    %3 = vector.load %arg7[%c0, %c0_1] : memref<16x96xf32, #tpu.memory_space<vmem>>, vector<16x96xf32>
    %c0_2 = arith.constant 0 : index
    %c0_3 = arith.constant 0 : index
    %4 = vector.load %arg3[%c0_2, %c0_3] : memref<16x32xbf16, #tpu.memory_space<vmem>>, vector<16x32xbf16>
    %c0_4 = arith.constant 0 : index
    %c0_5 = arith.constant 0 : index
    %5 = vector.load %arg4[%c0_4, %c0_5] : memref<32x96xbf16, #tpu.memory_space<vmem>>, vector<32x96xbf16>
    %cst = arith.constant dense<0.000000e+00> : vector<16x96xf32>
    %6 = tpu.matmul %4, %5, %cst {dimension_numbers = #tpu.dot_dimension_numbers<[1], [0], [0], [1], [0, 0, 1, 1], [], []>} : vector<16x32xbf16>, vector<32x96xbf16>, vector<16x96xf32> -> vector<16x96xf32>
    %7 = arith.addf %3, %6 : vector<16x96xf32>
    %c0_6 = arith.constant 0 : index
    %c0_7 = arith.constant 0 : index
    %8 = vector.load %arg7[%c0_6, %c0_7] : memref<16x96xf32, #tpu.memory_space<vmem>>, vector<16x96xf32>
    tpu.vector_store %arg7[%c0_6, %c0_7], %7 {strides = array<i32>} : memref<16x96xf32, #tpu.memory_space<vmem>>, vector<16x96xf32>,
    %c0_i32_8 = arith.constant 0 : i32
    %9 = arith.cmpi eq, %arg2, %c0_i32_8 : i32
    %10 = arith.extui %9 : i1 to i32
    %c0_i32_9 = arith.constant 0 : i32
    %11 = arith.cmpi ne, %10, %c0_i32_9 : i32
    scf.if %11 {
      %c0_10 = arith.constant 0 : index
      %c0_11 = arith.constant 0 : index
      %12 = vector.load %arg7[%c0_10, %c0_11] : memref<16x96xf32, #tpu.memory_space<vmem>>, vector<16x96xf32>
      %c0_12 = arith.constant 0 : index
      %c0_13 = arith.constant 0 : index
      %13 = vector.load %arg5[%c0_12, %c0_13] : memref<1x96xf32, #tpu.memory_space<vmem>>, vector<1x96xf32>
      %14 = vector.broadcast %13 : vector<1x96xf32> to vector<16x96xf32>
      %15 = arith.addf %12, %14 : vector<16x96xf32>
      %16 = arith.truncf %15 : vector<16x96xf32> to vector<16x96xbf16>
      %c0_14 = arith.constant 0 : index
      %c0_15 = arith.constant 0 : index
      %17 = vector.load %arg6[%c0_14, %c0_15] : memref<16x96xbf16, #tpu.memory_space<vmem>>, vector<16x96xbf16>
      tpu.vector_store %arg6[%c0_14, %c0_15], %16 {strides = array<i32>} : memref<16x96xbf16, #tpu.memory_space<vmem>>, vector<16x96xbf16>,
    } else {
    }
    return
  }
  func.func @transform_0(%arg0: i32, %arg1: i32, %arg2: i32) -> (i32, i32) {
    %c0_i32 = arith.constant 0 : i32
    return %arg0, %arg2 : i32, i32
  }
  func.func @transform_1(%arg0: i32, %arg1: i32, %arg2: i32) -> (i32, i32) {
    %c0_i32 = arith.constant 0 : i32
    return %arg2, %arg1 : i32, i32
  }
  func.func @transform_2(%arg0: i32, %arg1: i32, %arg2: i32) -> (i32, i32) {
    %c0_i32 = arith.constant 0 : i32
    %c0_i32_0 = arith.constant 0 : i32
    return %c0_i32, %arg1 : i32, i32
  }
  func.func @transform_3(%arg0: i32, %arg1: i32, %arg2: i32) -> (i32, i32) {
    %c0_i32 = arith.constant 0 : i32
    return %arg0, %arg1 : i32, i32
  }
}

</mosaic_0001>

<bundles_post_ra>
// kernel: tpu_custom_call.1
= control target key start
LH: loop header
LB: loop body
LE: loop exit
PB: predicated region body
PF: predicated region fallthrough
CT: control target
= control target key end

     0   :  { %8 = vsyncpa [#allocation4], 0  ;;  %s350_s0 = inlined_call_operand.hbm [shape: bf16[16,32], index: 0, kind: input, shape index: {}]   ;;  %s351_s1 = inlined_call_operand.hbm [shape: bf16[32,96], index: 1, kind: input, shape index: {}]   ;;  %s352_s2 = inlined_call_operand.vmem [shape: f32[1,96], index: 2, kind: input, shape index: {}]   ;;  %s353_s3 = inlined_call_operand.hbm [shape: bf16[16,96], index: 3, kind: output, shape index: {}]  }
   0x1   :  { %9 = vsyncpa [#allocation7], 0 }
   0x2   :  { %10 = vsyncpa [#allocation5], 0  ;;  %s271_s12 = smov [#allocation3]   ;;  %s199_s16 = scalar_lea.hbm %s350_s0, 128 }
   0x3   :  { %s16_s13 = sshll.u32 %s271_s12, 4  ;;  %p200_p0 = scmp.ne.s32.totalorder %s350_s0, %s199_s16  ;;  %s17_s13 = int_to_ptr.vmem [resolvable:$true] %s16_s13 }
   0x4   :  { %p203_p1 = scmp.lt.u32.totalorder %s199_s16, %s350_s0 }
   0x6   :  { %p205_p2 = pnand %p203_p1, %p200_p0 }
   0x8   :  { %208 = shalt.err (!%p205_p2)
}
   0x9   :  { %s209_s21 = scalar_lea.vmem %s17_s13, 128  ;;  %p214_p4 = scmp.lt.s32.totalorder %s17_s13, %s17_s13 }
   0xa   :  { %p210_p3 = scmp.ne.s32.totalorder %s17_s13, %s209_s21  ;;  %p215_p5 = scmp.lt.s32.totalorder %s209_s21, %s209_s21 }
   0xc   :  { %p216_p6 = por %p215_p5, %p214_p4 }
   0xe   :  { %p217_p7 = pnand %p216_p6, %p210_p3 }
  0x10   :  { %220 = shalt.err (!%p217_p7)
}
  0x11   :  { %s272_s22 = smov 64   ;;  %s273_s23 = smov 4  }
  0x12   :  { %22 = dma.hbm_to_vmem [thread:$0]  %s350_s0, 128, %s17_s13, [#allocation4], %s272_s22, %s272_s22, %s273_s23  }
  0x13   :  { %s274_s26 = smov [#allocation6]   ;;  %s221_s30 = scalar_lea.hbm %s351_s1, 256 }
  0x14   :  { %s28_s27 = sshll.u32 %s274_s26, 4  ;;  %p222_p8 = scmp.ne.s32.totalorder %s351_s1, %s221_s30  ;;  %s29_s27 = int_to_ptr.vmem [resolvable:$true] %s28_s27 }
  0x15   :  { %p225_p9 = scmp.lt.u32.totalorder %s221_s30, %s351_s1 }
  0x17   :  { %p227_p10 = pnand %p225_p9, %p222_p8 }
  0x19   :  { %230 = shalt.err (!%p227_p10)
}
  0x1a   :  { %s231_s8 = scalar_lea.vmem %s29_s27, 256  ;;  %p236_p12 = scmp.lt.s32.totalorder %s29_s27, %s29_s27 }
  0x1b   :  { %p232_p11 = scmp.ne.s32.totalorder %s29_s27, %s231_s8  ;;  %p237_p13 = scmp.lt.s32.totalorder %s231_s8, %s231_s8 }
  0x1d   :  { %p238_p0 = por %p237_p13, %p236_p12 }
  0x1f   :  { %p239_p1 = pnand %p238_p0, %p232_p11 }
  0x21   :  { %242 = shalt.err (!%p239_p1)
}
  0x22   :  { %34 = dma.hbm_to_vmem [thread:$0]  %s351_s1, 256, %s29_s27, [#allocation7], %s272_s22, %s272_s22, %s273_s23  }
  0x23   :  { %265 = dma.done.wait [#allocation4], 128  }
  0x24   :  { %266 = vsyncadd [#allocation4], 4294967168 }
  0x25   :  { %267 = dma.done.wait [#allocation7], 256  }
  0x26   :  { %268 = vsyncadd [#allocation7], 4294967040  ;;  %vm48_vm0 = vcmask 785408   ;;  %v275_v0 = vmov 0.0   ;;  %vm276_vm1 = vmmov 0   ;;  %v196_v1 = vld [vmem:[#allocation6] sm:$0xff]  }
  0x27   :  { %49 = vst.msk [vmem:[#allocation2] sm:$0xff] %vm48_vm0, %v275_v0  ;;  %50 = vst.msk [vmem:[#allocation2 + $0x8] sm:$0xff] %vm48_vm0, %v275_v0  ;;  %181 = vmatprep.subr.bf16.mxu0 %v275_v0  ;;  %185 = vmatprep.mubr.msk.bf16.mxu0 %vm276_vm1, %v275_v0  ;;  %v197_v2 = vld [vmem:[#allocation6 + $0x8] sm:$0xff]   ;;  %v198_v3 = vld [vmem:[#allocation3] sm:$0xff]   ;;  %vm76_vm2 = vcmask 261120   ;;  %vm148_vm3 = vcmask 781312  }
  0x28   :  { %182 = vmatpush3.bf16.msra.mxu0 %v196_v1  ;;  %v173_v12 = vld [vmem:[%s352_s2] ss:$0 sm:$0xff]  ;;  %s277_s11 = smov [#allocation8]  }
  0x29   :  { %183 = vmatprep.subr.bf16.mxu0 %v275_v0  ;;  %s156_s12 = sshll.u32 %s277_s11, 4  ;;  %s157_s12 = int_to_ptr.vmem [resolvable:$true] %s156_s12 }
  0x2a   :  { %s243_s13 = scalar_lea.vmem %s157_s12, 128  ;;  %p248_p3 = scmp.lt.s32.totalorder %s157_s12, %s157_s12 }
  0x2b   :  { %p244_p2 = scmp.ne.s32.totalorder %s157_s12, %s243_s13  ;;  %p249_p4 = scmp.lt.s32.totalorder %s243_s13, %s243_s13 }
  0x2c   :  { %184 = vmatpush3.bf16.msra.mxu0 %v197_v2 }
  0x2d   :  { %p250_p5 = por %p249_p4, %p248_p3 }
  0x2e   :  { %v51_v4 = vld [vmem:[#allocation2] sm:$0xff]  ;;  %v52_v6 = vld [vmem:[#allocation2 + $0x8] sm:$0xff] }
  0x2f   :  { %186 = vmatmul.mubr.msk.bf16.vlgmr.msra.gmra.mrb[0].mxu0 %vm76_vm2, %v198_v3  ;;  %p251_p6 = pnand %p250_p5, %p244_p2 }
 0x102   :  { %v114_v5 = vpop.f32.mrb[0].mxu0 }
 0x103   :  { %v121_v7 = vadd.f32 %v114_v5, %v51_v4  ;;  %v187_v8 = vpop.f32.mrb[1].mxu0 }
 0x104   :  { %v117_v9 = vpop.f32.mrb[2].mxu0 }
 0x105   :  { %124 = vst.msk [vmem:[#allocation2] sm:$0xff] %vm48_vm0, %v121_v7  ;;  %v122_v10 = vadd.f32 %v117_v9, %v52_v6  ;;  %v188_v11 = vpop.f32.mrb[3].mxu0 }
 0x107   :  { %125 = vst.msk [vmem:[#allocation2 + $0x8] sm:$0xff] %vm48_vm0, %v122_v10 }
 0x10c   :  { %v129_v13 = vld [vmem:[#allocation2] sm:$0xff] }
 0x10d   :  { %v138_v14 = vadd.f32 %v173_v12, %v129_v13 }
 0x10e   :  { %v130_v15 = vld [vmem:[#allocation2 + $0x8] sm:$0xff] }
 0x10f   :  { %v139_v16 = vadd.f32 %v173_v12, %v130_v15  ;;  %v176_v17 = vpack.c.bf16 %v138_v14, %v138_v14 }
 0x111   :  { %v177_v18 = vpack.c.bf16 %v139_v16, %v139_v16  ;;  %149 = vst.msk [vmem:[#allocation8] sm:$0xf] %vm148_vm3, %v176_v17 }
 0x113   :  { %150 = vst.msk [vmem:[#allocation8 + $0x4] sm:$0xf] %vm148_vm3, %v177_v18 }
 0x114   :  { %254 = shalt.err (!%p251_p6)
}
 0x115   :  { %s255_s15 = scalar_lea.hbm %s353_s3, 128 }
 0x116   :  { %p256_p7 = scmp.ne.s32.totalorder %s353_s3, %s255_s15  ;;  %p259_p8 = scmp.lt.u32.totalorder %s255_s15, %s353_s3 }
 0x118   :  { %p261_p9 = pnand %p259_p8, %p256_p7 }
 0x11a   :  { %264 = shalt.err (!%p261_p9)
}
 0x11b   :  { %162 = dma.vmem_to_hbm [thread:$0]  %s157_s12, 128, %s353_s3, [#allocation5], %s272_s22, %s272_s22, %s273_s23  }
 0x11c   :  { %269 = dma.done.wait [#allocation5], 128  }
 0x11d   :  { %270 = vsyncadd [#allocation5], 4294967168 }
 0x11e   :  { %166 = vsyncpa [#allocation4], 1 }
 0x11f   :  { %167 = vsyncpa [#allocation7], 1 }
 0x120   :  { %168 = vsyncpa [#allocation5], 1 }

</bundles_post_ra>
